<compile_context>
chip_gen: v7x
topology: tpu7x:2x2x1
jax: 0.10.0
libtpu: 0.0.40
codegen_flags: <defaults>
</compile_context>

<pallas_src>
import functools
import math

import jax
import jax.numpy as jnp
from jax.experimental import pallas as pl
from jax.experimental.pallas import tpu as pltpu

_INV_SQRT2 = 1.0 / math.sqrt(2.0)


def _round_up(x, m):
    return ((x + m - 1) // m) * m


def _geglu_kernel(x_ref, wh_ref, wg_ref, bh_ref, bg_ref, o_ref,
                  acc_h_ref, acc_g_ref, *, matmul_dtype=None):
    # x_ref:  (tm, tk)   row/K tile of flattened hidden_states
    # wh_ref: (tk, tn)   "hidden" column tile of the projection weight
    # wg_ref: (tk, tn)   "gate"   column tile of the projection weight
    # bh_ref: (1, tn)    hidden bias tile   (resident while the column tile is)
    # bg_ref: (1, tn)    gate bias tile
    # o_ref:  (tm, tn)   output tile
    # acc_*:  (tm, tn)   f32 accumulators (persist across the K grid axis)
    k = pl.program_id(2)

    @pl.when(k == 0)
    def _init():
        acc_h_ref[...] = jnp.zeros_like(acc_h_ref)
        acc_g_ref[...] = jnp.zeros_like(acc_g_ref)

    x = x_ref[...]
    wh = wh_ref[...]
    wg = wg_ref[...]
    if matmul_dtype is not None:
        # Optional reduced-precision MXU feed (numerics differ slightly from torch).
        x = x.astype(matmul_dtype)
        wh = wh.astype(matmul_dtype)
        wg = wg.astype(matmul_dtype)

    acc_h_ref[...] += jnp.dot(x, wh, preferred_element_type=jnp.float32)
    acc_g_ref[...] += jnp.dot(x, wg, preferred_element_type=jnp.float32)

    @pl.when(k == pl.num_programs(2) - 1)
    def _finalize():
        h = acc_h_ref[...] + bh_ref[...].astype(jnp.float32)
        g = acc_g_ref[...] + bg_ref[...].astype(jnp.float32)
        # Exact (erf) GELU in f32, matching torch.nn.functional.gelu(gate.float()).
        gelu_g = 0.5 * g * (1.0 + jax.lax.erf(g * _INV_SQRT2))
        o_ref[...] = (h * gelu_g).astype(o_ref.dtype)


def geglu(hidden_states, w, b, *, tm=512, tn=256, tk=None,
          matmul_dtype=None, vmem_budget_bytes=48 * 1024 * 1024):
    """GEGLU forward.

    hidden_states: (..., dim_in)
    w:             (dim_in, 2*dim_out)   (transpose of torch Linear.weight)
    b:             (2*dim_out,)
    returns:       (..., dim_out)
    """
    orig_shape = hidden_states.shape
    dim_in = orig_shape[-1]
    two_dout = w.shape[1]
    dim_out = two_dout // 2
    assert w.shape[0] == dim_in and b.shape == (two_dout,)

    x = hidden_states.reshape(-1, dim_in)
    M = x.shape[0]
    out_dtype = hidden_states.dtype

    xb = jnp.dtype(x.dtype).itemsize
    wb = jnp.dtype(w.dtype).itemsize
    bb = jnp.dtype(b.dtype).itemsize
    ob = jnp.dtype(out_dtype).itemsize

    # ---- Row (M) tile: sublane multiple for the activation dtype (8 f32 / 16 bf16 / 32 i8).
    sublane = max(8, 32 // xb)
    tm_eff = max(sublane, (tm // sublane) * sublane)
    tm_eff = min(tm_eff, _round_up(M, sublane))

    # ---- Column (dim_out) tile.
    if dim_out % 128 == 0:
        # Fast path: keep the full weight/bias arrays and select the hidden/gate
        # halves per tile via the index_map (column-block offset of num_n).
        tn_eff = min(max(128, (tn // 128) * 128), dim_out)
        while dim_out % tn_eff:
            tn_eff -= 128
        fast_halves = True
    else:
        # Fallback for non-128-aligned dim_out: full-width blocks (block dim equals
        # the array dim, satisfying the (8,128) rule); halves sliced once here.
        tn_eff = dim_out
        fast_halves = False
    num_n = dim_out // tn_eff

    # ---- K (dim_in) tile: whole-K unless it blows the VMEM budget (or caller forces tk).
    if tk is not None:
        assert tk == dim_in or (tk % 128 == 0 and dim_in % tk == 0)
        tk_eff = tk
    else:
        tk_eff = dim_in

    def vmem_bytes(tm_, tn_, tk_):
        ins = tm_ * tk_ * xb + 2 * tk_ * tn_ * wb + 2 * tn_ * bb
        outs = tm_ * tn_ * ob
        scratch = 2 * tm_ * tn_ * 4
        return 2 * (ins + outs) + scratch      # inputs/outputs double-buffered

    budget = int(vmem_budget_bytes * 0.9)      # headroom for compiler scratch
    if tk is None:
        for _ in range(64):
            if vmem_bytes(tm_eff, tn_eff, tk_eff) <= budget:
                break
            if tk_eff % 256 == 0:              # split K first (keeps 128-aligned tiles)
                tk_eff //= 2
            elif tm_eff > sublane:             # then shrink the row tile
                tm_eff = max(sublane, (tm_eff // 2 // sublane) * sublane)
            else:
                break
    num_k = dim_in // tk_eff
    num_m = pl.cdiv(M, tm_eff)                 # ragged tail handled by Pallas masking

    if fast_halves:
        wh_arg = wg_arg = w
        bh_arg = bg_arg = b.reshape(1, two_dout)
        gate_off = num_n
    else:
        wh_arg, wg_arg = w[:, :dim_out], w[:, dim_out:]
        bh_arg = b[:dim_out].reshape(1, dim_out)
        bg_arg = b[dim_out:].reshape(1, dim_out)
        gate_off = 0

    # ---- Grid ordering: minimize the dominant re-streamed operand (HBM-bound kernel).
    #   col-leading (N, M, K): weight/bias resident across row tiles;
    #       extra traffic = (num_n - 1) * M * dim_in       (x re-streamed)
    #   row-leading (M, N, K): x resident across column tiles;
    #       extra traffic = (num_m - 1) * 2*dim_in*dim_out (weight re-streamed)
    col_extra = (num_n - 1) * M * dim_in * xb
    row_extra = (num_m - 1) * 2 * dim_in * dim_out * wb
    col_leading = col_extra <= row_extra
    # v7x megacore: give the leading "parallel" axis extent >= 2 when the swap is
    # traffic-free (a degenerate leading axis re-streams nothing anyway).
    if col_leading and num_n == 1 and num_m > 1:
        col_leading = False
    elif (not col_leading) and num_m == 1 and num_n > 1:
        col_leading = True

    if col_leading:
        grid = (num_n, num_m, num_k)
        x_map = lambda j, i, k: (i, k)
        wh_map = lambda j, i, k: (k, j)
        wg_map = lambda j, i, k: (k, j + gate_off)
        bh_map = lambda j, i, k: (0, j)
        bg_map = lambda j, i, k: (0, j + gate_off)
        o_map = lambda j, i, k: (i, j)
    else:
        grid = (num_m, num_n, num_k)
        x_map = lambda i, j, k: (i, k)
        wh_map = lambda i, j, k: (k, j)
        wg_map = lambda i, j, k: (k, j + gate_off)
        bh_map = lambda i, j, k: (0, j)
        bg_map = lambda i, j, k: (0, j + gate_off)
        o_map = lambda i, j, k: (i, j)

    compiler_kwargs = dict(
        dimension_semantics=("parallel", "parallel", "arbitrary"))
    # Only override the scoped VMEM limit when the working set actually needs it
    # (v5e's default scoped budget is 16 MiB; v6e/v7x default is 32 MiB).
    if vmem_bytes(tm_eff, tn_eff, tk_eff) > 12 * 1024 * 1024:
        compiler_kwargs["vmem_limit_bytes"] = int(vmem_budget_bytes)

    kernel = functools.partial(_geglu_kernel, matmul_dtype=matmul_dtype)

    out = pl.pallas_call(
        kernel,
        out_shape=jax.ShapeDtypeStruct((M, dim_out), out_dtype),
        grid_spec=pltpu.PrefetchScalarGridSpec(
            num_scalar_prefetch=0,
            grid=grid,
            in_specs=[
                pl.BlockSpec((tm_eff, tk_eff), x_map),
                pl.BlockSpec((tk_eff, tn_eff), wh_map),
                pl.BlockSpec((tk_eff, tn_eff), wg_map),
                pl.BlockSpec((1, tn_eff), bh_map),
                pl.BlockSpec((1, tn_eff), bg_map),
            ],
            out_specs=pl.BlockSpec((tm_eff, tn_eff), o_map),
            scratch_shapes=[
                pltpu.VMEM((tm_eff, tn_eff), jnp.float32),
                pltpu.VMEM((tm_eff, tn_eff), jnp.float32),
            ],
        ),
        compiler_params=pltpu.CompilerParams(**compiler_kwargs),
    )(x, wh_arg, wg_arg, bh_arg, bg_arg)

    return out.reshape(*orig_shape[:-1], dim_out)


if __name__ == "__main__":
    key = jax.random.PRNGKey(0)
    k1, k2, k3, k4, k5, k6 = jax.random.split(key, 6)

    def reference(x, w, b, dim_out):
        proj = x @ w + b
        h, g = proj[..., :dim_out], proj[..., dim_out:]
        return h * (0.5 * g * (1.0 + jax.lax.erf(g * _INV_SQRT2)))

    # --- Config A: ragged M (18 rows, tm=8 -> masked tail block), index-map half
    #     selection (num_n=2), column-leading grid, single K block (dim_in=64). ---
    batch, seq, dim_in, dim_out = 2, 9, 64, 256
    bound = 1.0 / math.sqrt(dim_in)
    x_a = jax.random.normal(k1, (batch, seq, dim_in), dtype=jnp.float32)
    w_a = jax.random.uniform(k2, (dim_in, 2 * dim_out), jnp.float32, -bound, bound)
    b_a = jax.random.uniform(k3, (2 * dim_out,), jnp.float32, -bound, bound)
    out_a = geglu(x_a, w_a, b_a, tm=8, tn=128)
    jax.block_until_ready(out_a)
    ref_a = reference(x_a, w_a, b_a, dim_out)
    assert out_a.shape == (batch, seq, dim_out)
    err_a = float(jnp.max(jnp.abs(out_a - ref_a)))
    assert jnp.allclose(out_a, ref_a, atol=1e-4, rtol=1e-4), f"config A max abs err {err_a}"

    # --- Config B: K-axis accumulation (dim_in=256, tk=128 -> num_k=2) and
    #     row-leading grid (num_n=1, num_m=2, so the leading axis keeps extent 2). ---
    batch, seq, dim_in, dim_out = 2, 8, 256, 128
    bound = 1.0 / math.sqrt(dim_in)
    x_b = jax.random.normal(k4, (batch, seq, dim_in), dtype=jnp.float32)
    w_b = jax.random.uniform(k5, (dim_in, 2 * dim_out), jnp.float32, -bound, bound)
    b_b = jax.random.uniform(k6, (2 * dim_out,), jnp.float32, -bound, bound)
    out_b = geglu(x_b, w_b, b_b, tm=8, tn=128, tk=128)
    jax.block_until_ready(out_b)
    ref_b = reference(x_b, w_b, b_b, dim_out)
    assert out_b.shape == (batch, seq, dim_out)
    err_b = float(jnp.max(jnp.abs(out_b - ref_b)))
    assert jnp.allclose(out_b, ref_b, atol=1e-4, rtol=1e-4), f"config B max abs err {err_b}"

    print("KERNEL_OK")
</pallas_src>

<mosaic_0001>
module attributes {stable_mosaic.version = 11 : i64} {
  func.func @_geglu_kernel(%arg0: i32, %arg1: i32, %arg2: i32, %arg3: memref<8x64xf32, #tpu.memory_space<vmem>>, %arg4: memref<64x128xf32, #tpu.memory_space<vmem>>, %arg5: memref<64x128xf32, #tpu.memory_space<vmem>>, %arg6: memref<1x128xf32, #tpu.memory_space<vmem>>, %arg7: memref<1x128xf32, #tpu.memory_space<vmem>>, %arg8: memref<8x128xf32, #tpu.memory_space<vmem>>, %arg9: memref<8x128xf32, #tpu.memory_space<vmem>>, %arg10: memref<8x128xf32, #tpu.memory_space<vmem>>) attributes {dimension_semantics = [#tpu.dimension_semantics<parallel>, #tpu.dimension_semantics<parallel>, #tpu.dimension_semantics<arbitrary>], iteration_bounds = array<i64: 2, 3, 1>, scalar_prefetch = 0 : i64, scratch_operands = 2 : i64, tpu.core_type = #tpu.core_type<tc>, window_params = [{transform_indices = @transform_0, window_bounds = array<i64: 8, 64>}, {transform_indices = @transform_1, window_bounds = array<i64: 64, 128>}, {transform_indices = @transform_2, window_bounds = array<i64: 64, 128>}, {transform_indices = @transform_3, window_bounds = array<i64: 1, 128>}, {transform_indices = @transform_4, window_bounds = array<i64: 1, 128>}, {transform_indices = @transform_5, window_bounds = array<i64: 8, 128>}]} {
    %c0_i32 = arith.constant 0 : i32
    %0 = arith.cmpi eq, %arg2, %c0_i32 : i32
    %1 = arith.extui %0 : i1 to i32
    %c0_i32_0 = arith.constant 0 : i32
    %2 = arith.cmpi ne, %1, %c0_i32_0 : i32
    scf.if %2 {
      %cst_17 = arith.constant 0.000000e+00 : f32
      %17 = vector.broadcast %cst_17 : f32 to vector<8x128xf32>
      %c0_18 = arith.constant 0 : index
      %c0_19 = arith.constant 0 : index
      %18 = vector.load %arg9[%c0_18, %c0_19] : memref<8x128xf32, #tpu.memory_space<vmem>>, vector<8x128xf32>
      tpu.vector_store %arg9[%c0_18, %c0_19], %17 {strides = array<i32>} : memref<8x128xf32, #tpu.memory_space<vmem>>, vector<8x128xf32>,
      %cst_20 = arith.constant 0.000000e+00 : f32
      %19 = vector.broadcast %cst_20 : f32 to vector<8x128xf32>
      %c0_21 = arith.constant 0 : index
      %c0_22 = arith.constant 0 : index
      %20 = vector.load %arg10[%c0_21, %c0_22] : memref<8x128xf32, #tpu.memory_space<vmem>>, vector<8x128xf32>
      tpu.vector_store %arg10[%c0_21, %c0_22], %19 {strides = array<i32>} : memref<8x128xf32, #tpu.memory_space<vmem>>, vector<8x128xf32>,
    } else {
    }
    %c0 = arith.constant 0 : index
    %c0_1 = arith.constant 0 : index
    %3 = vector.load %arg3[%c0, %c0_1] : memref<8x64xf32, #tpu.memory_space<vmem>>, vector<8x64xf32>
    %c0_2 = arith.constant 0 : index
    %c0_3 = arith.constant 0 : index
    %4 = vector.load %arg4[%c0_2, %c0_3] : memref<64x128xf32, #tpu.memory_space<vmem>>, vector<64x128xf32>
    %c0_4 = arith.constant 0 : index
    %c0_5 = arith.constant 0 : index
    %5 = vector.load %arg5[%c0_4, %c0_5] : memref<64x128xf32, #tpu.memory_space<vmem>>, vector<64x128xf32>
    %c0_6 = arith.constant 0 : index
    %c0_7 = arith.constant 0 : index
    %6 = vector.load %arg9[%c0_6, %c0_7] : memref<8x128xf32, #tpu.memory_space<vmem>>, vector<8x128xf32>
    %cst = arith.constant dense<0.000000e+00> : vector<8x128xf32>
    %7 = tpu.matmul %3, %4, %cst {dimension_numbers = #tpu.dot_dimension_numbers<[1], [0], [0], [1], [0, 0, 1, 1], [], []>} : vector<8x64xf32>, vector<64x128xf32>, vector<8x128xf32> -> vector<8x128xf32>
    %8 = arith.addf %6, %7 : vector<8x128xf32>
    %c0_8 = arith.constant 0 : index
    %c0_9 = arith.constant 0 : index
    %9 = vector.load %arg9[%c0_8, %c0_9] : memref<8x128xf32, #tpu.memory_space<vmem>>, vector<8x128xf32>
    tpu.vector_store %arg9[%c0_8, %c0_9], %8 {strides = array<i32>} : memref<8x128xf32, #tpu.memory_space<vmem>>, vector<8x128xf32>,
    %c0_10 = arith.constant 0 : index
    %c0_11 = arith.constant 0 : index
    %10 = vector.load %arg10[%c0_10, %c0_11] : memref<8x128xf32, #tpu.memory_space<vmem>>, vector<8x128xf32>
    %cst_12 = arith.constant dense<0.000000e+00> : vector<8x128xf32>
    %11 = tpu.matmul %3, %5, %cst_12 {dimension_numbers = #tpu.dot_dimension_numbers<[1], [0], [0], [1], [0, 0, 1, 1], [], []>} : vector<8x64xf32>, vector<64x128xf32>, vector<8x128xf32> -> vector<8x128xf32>
    %12 = arith.addf %10, %11 : vector<8x128xf32>
    %c0_13 = arith.constant 0 : index
    %c0_14 = arith.constant 0 : index
    %13 = vector.load %arg10[%c0_13, %c0_14] : memref<8x128xf32, #tpu.memory_space<vmem>>, vector<8x128xf32>
    tpu.vector_store %arg10[%c0_13, %c0_14], %12 {strides = array<i32>} : memref<8x128xf32, #tpu.memory_space<vmem>>, vector<8x128xf32>,
    %c0_i32_15 = arith.constant 0 : i32
    %14 = arith.cmpi eq, %arg2, %c0_i32_15 : i32
    %15 = arith.extui %14 : i1 to i32
    %c0_i32_16 = arith.constant 0 : i32
    %16 = arith.cmpi ne, %15, %c0_i32_16 : i32
    scf.if %16 {
      %c0_17 = arith.constant 0 : index
      %c0_18 = arith.constant 0 : index
      %17 = vector.load %arg9[%c0_17, %c0_18] : memref<8x128xf32, #tpu.memory_space<vmem>>, vector<8x128xf32>
      %c0_19 = arith.constant 0 : index
      %c0_20 = arith.constant 0 : index
      %18 = vector.load %arg6[%c0_19, %c0_20] : memref<1x128xf32, #tpu.memory_space<vmem>>, vector<1x128xf32>
      %19 = vector.broadcast %18 : vector<1x128xf32> to vector<8x128xf32>
      %20 = arith.addf %17, %19 : vector<8x128xf32>
      %c0_21 = arith.constant 0 : index
      %c0_22 = arith.constant 0 : index
      %21 = vector.load %arg10[%c0_21, %c0_22] : memref<8x128xf32, #tpu.memory_space<vmem>>, vector<8x128xf32>
      %c0_23 = arith.constant 0 : index
      %c0_24 = arith.constant 0 : index
      %22 = vector.load %arg7[%c0_23, %c0_24] : memref<1x128xf32, #tpu.memory_space<vmem>>, vector<1x128xf32>
      %23 = vector.broadcast %22 : vector<1x128xf32> to vector<8x128xf32>
      %24 = arith.addf %21, %23 : vector<8x128xf32>
      %cst_25 = arith.constant 5.000000e-01 : f32
      %25 = vector.broadcast %cst_25 : f32 to vector<8x128xf32>
      %26 = arith.mulf %25, %24 : vector<8x128xf32>
      %cst_26 = arith.constant 0.707106769 : f32
      %27 = vector.broadcast %cst_26 : f32 to vector<8x128xf32>
      %28 = arith.mulf %24, %27 : vector<8x128xf32>
      %29 = math.erf %28 : vector<8x128xf32>
      %cst_27 = arith.constant 1.000000e+00 : f32
      %30 = vector.broadcast %cst_27 : f32 to vector<8x128xf32>
      %31 = arith.addf %30, %29 : vector<8x128xf32>
      %32 = arith.mulf %26, %31 : vector<8x128xf32>
      %33 = arith.mulf %20, %32 : vector<8x128xf32>
      %c0_28 = arith.constant 0 : index
      %c0_29 = arith.constant 0 : index
      %34 = vector.load %arg8[%c0_28, %c0_29] : memref<8x128xf32, #tpu.memory_space<vmem>>, vector<8x128xf32>
      tpu.vector_store %arg8[%c0_28, %c0_29], %33 {strides = array<i32>} : memref<8x128xf32, #tpu.memory_space<vmem>>, vector<8x128xf32>,
    } else {
    }
    return
  }
  func.func @transform_0(%arg0: i32, %arg1: i32, %arg2: i32) -> (i32, i32) {
    %c0_i32 = arith.constant 0 : i32
    return %arg1, %arg2 : i32, i32
  }
  func.func @transform_1(%arg0: i32, %arg1: i32, %arg2: i32) -> (i32, i32) {
    %c0_i32 = arith.constant 0 : i32
    return %arg2, %arg0 : i32, i32
  }
  func.func @transform_2(%arg0: i32, %arg1: i32, %arg2: i32) -> (i32, i32) {
    %c2_i32 = arith.constant 2 : i32
    %0 = arith.addi %arg0, %c2_i32 : i32
    %c0_i32 = arith.constant 0 : i32
    return %arg2, %0 : i32, i32
  }
  func.func @transform_3(%arg0: i32, %arg1: i32, %arg2: i32) -> (i32, i32) {
    %c0_i32 = arith.constant 0 : i32
    %c0_i32_0 = arith.constant 0 : i32
    return %c0_i32, %arg0 : i32, i32
  }
  func.func @transform_4(%arg0: i32, %arg1: i32, %arg2: i32) -> (i32, i32) {
    %c2_i32 = arith.constant 2 : i32
    %0 = arith.addi %arg0, %c2_i32 : i32
    %c0_i32 = arith.constant 0 : i32
    %c0_i32_0 = arith.constant 0 : i32
    return %c0_i32, %0 : i32, i32
  }
  func.func @transform_5(%arg0: i32, %arg1: i32, %arg2: i32) -> (i32, i32) {
    %c0_i32 = arith.constant 0 : i32
    return %arg1, %arg0 : i32, i32
  }
}

</mosaic_0001>

<bundles_post_ra>
// kernel: tpu_custom_call.1
= control target key start
LH: loop header
LB: loop body
LE: loop exit
PB: predicated region body
PF: predicated region fallthrough
CT: control target
= control target key end

     0   :  { %s1820_s0 = inlined_call_operand.hbm [shape: f32[18,64], index: 0, kind: input, shape index: {}]   ;;  %s1821_s1 = inlined_call_operand.hbm [shape: f32[64,512], index: 1, kind: input, shape index: {}]   ;;  %s1822_s2 = inlined_call_operand.hbm [shape: f32[64,512], index: 2, kind: input, shape index: {}]   ;;  %s1823_s3 = inlined_call_operand.vmem [shape: f32[1,512], index: 3, kind: input, shape index: {}]   ;;  %s1824_s4 = inlined_call_operand.vmem [shape: f32[1,512], index: 4, kind: input, shape index: {}]   ;;  %s1825_s5 = inlined_call_operand.hbm [shape: f32[18,256], index: 5, kind: output, shape index: {}]  }
   0x1   :  { %1849 = sst [smem:[#allocation30_spill]] %s1821_s1 }
   0x2   :  { %1850 = sst [smem:[#allocation31_spill]] %s1823_s3 }
   0x3   :  { %1851 = sst [smem:[#allocation32_spill]] %s1824_s4 }
   0x4   :  { %1852 = sst [smem:[#allocation33_spill]] %s1825_s5 }
   0x5   :  { %10 = vsyncpa [#allocation5], 0 }
   0x6   :  { %12 = vsyncpa [#allocation5 + $0x1], 0 }
   0x7   :  { %13 = vsyncpa [#allocation8], 0 }
   0x8   :  { %15 = vsyncpa [#allocation8 + $0x1], 0 }
   0x9   :  { %16 = vsyncpa [#allocation6], 0 }
   0xa   :  { %18 = vsyncpa [#allocation6 + $0x1], 0  ;;  %s1343_s18 = smov 0   ;;  %s1345_s19 = smov 0  }
   0xb   :  { %s1347_s20 = smov 0   ;;  %s1349_s21 = smov 0  }
   0xc   :  { %s1351_s22 = smov 0   ;;  %s1353_s23 = smov 0  }
   0xd   :  { %s1355_s24 = smov 0   ;;  %s1357_s25 = smov 0  }
   0xe   :  { %s1359_s26 = smov 0   ;;  %s1361_s27 = smov 0  }
   0xf   :  { %s1363_s28 = smov 0   ;;  %s1365_s29 = smov 0  }
  0x10   :  { %s1367_s30 = smov 0   ;;  %s1369_s6 = smov 0  }
  0x11   :  { %s1371_s7 = smov 0   ;;  %s1373_s8 = smov 0  }
  0x12   :  { %s1375_s9 = smov 0  }
  0x13 LB: > { %1853 = sst [smem:[#allocation15_spill]] %s1257_s23  ;;  %p60_p0 = scmp.eq.s32.totalorder %s1301_s9, 0  ;;  %s1301_s9 = sphi %s1375_s9, %s24_s9   ;;  %s1297_s8 = sphi %s1373_s8, %s1923_s8   ;;  %s1293_s7 = sphi %s1371_s7, %s1913_s7   ;;  %s1289_s6 = sphi %s1369_s6, %s1922_s6   ;;  %s1285_s30 = sphi %s1367_s30, %s1911_s30   ;;  %s1281_s29 = sphi %s1365_s29, %s1910_s29   ;;  %s1277_s28 = sphi %s1363_s28, %s1909_s28   ;;  %s1273_s27 = sphi %s1361_s27, %s1908_s27   ;;  %s1269_s26 = sphi %s1359_s26, %s1907_s26   ;;  %s1265_s25 = sphi %s1357_s25, %s1921_s25   ;;  %s1261_s24 = sphi %s1355_s24, %s1920_s24   ;;  %s1257_s23 = sphi %s1353_s23, %s1905_s23   ;;  %s1253_s22 = sphi %s1351_s22, %s1919_s22   ;;  %s1249_s21 = sphi %s1349_s21, %s1918_s21   ;;  %s1245_s20 = sphi %s1347_s20, %s1917_s20   ;;  %s1241_s19 = sphi %s1345_s19, %s1916_s19   ;;  %s1237_s18 = sphi %s1343_s18, %s1915_s18  }
  0x14   : > { %1854 = sst [smem:[#allocation16_spill]] %s1269_s26  ;;  %p87_p1 = scmp.ne.s32.totalorder %s1269_s26, %s1265_s25 }
  0x15   : > { %1855 = sst [smem:[#allocation17_spill]] %s1277_s28  ;;  %p1828_p4 = scmp.lt.s32.totalorder %s1301_s9, 6 }
  0x16   : > { %1856 = sst [smem:[#allocation18_spill]] %s1281_s29  ;;  %p89_p3 = por %p87_p1, %p60_p0 }
  0x17   : > { %1857 = sst [smem:[#allocation19_spill]] %s1285_s30  ;;  %s248_s10 = sand.u32 1, %s1301_s9  }
  0x18   : > { %1858 = sst [smem:[#allocation20_spill]] %s1289_s6  ;;  %s250_s11 = sand.u32 1, %s1269_s26  }
  0x19   : > { %1859 = sst [smem:[#allocation21_spill]] %s1293_s7  ;;  %s766_s12 = sshll.u32 %s250_s11, 6 }
  0x1a   : > { %1860 = sst [smem:[#allocation22_spill]] %s1297_s8  ;;  %s1827_s13 = sshll.u32 %s1297_s8, 7 }
  0x1b   : > { %s1861_s1 = sld [smem:[#allocation30_spill]]  ;;  %s252_s17 = scalar_lea.vmem [#allocation7], %s766_s12 }
  0x1c   : > { %s261_s5 = sshll.u32 %s252_s17, 4  ;;  %p1450_p5 = pnand %p1828_p4, %p89_p3  ;;  %s1446_s5 = int_to_ptr.vmem [resolvable:$true] %s261_s5 }
  0x1d   : > { %s1454_s11 = scalar_lea.sflag [#allocation8], %s248_s10 }
  0x1e   : > { %p1034_p7 = pneg %p1450_p5 }
  0x21   : > { %s1444_s16 = scalar_lea.hbm %s1861_s1, %s1827_s13  ;;  %s1037_s17 = scalar_lea.hbm %s1861_s1, 4096 }
  0x22   : > { %s1032_s14 = scalar_lea.hbm %s1444_s16, 1024  ;;  %p1038_p10 = scmp.lt.u32.totalorder %s1444_s16, %s1861_s1 }
  0x23   : > { %p1033_p6 = scmp.ne.s32.totalorder %s1444_s16, %s1032_s14  ;;  %p1039_p11 = scmp.lt.u32.totalorder %s1037_s17, %s1032_s14 }
  0x24   : > { %p1041_p13 = scmp.lt.u32.totalorder %s1032_s14, %s1444_s16 }
  0x25   : > { %p1035_p8 = pnand %p1034_p7, %p1033_p6  ;;  %p1040_p12 = por %p1039_p11, %p1038_p10 }
  0x27   : > { %p1036_p9 = pneg %p1035_p8  ;;  %p1042_p1 = por %p1041_p13, %p1040_p12 }
  0x29   : > { %p1043_p3 = pnand %p1042_p1, %p1036_p9 }
  0x2b   : > { %1046 = shalt.err (!%p1043_p3)
}
  0x2c   : > { %s1047_s10 = scalar_lea.vmem %s1446_s5, 1024  ;;  %s1303_s12 = smov [#allocation7]  }
  0x2d   : > { %p1048_p6 = scmp.ne.s32.totalorder %s1446_s5, %s1047_s10  ;;  %s1052_s15 = sshll.u32 %s1303_s12, 4  ;;  %s1053_s15 = int_to_ptr.vmem [resolvable:$false] %s1052_s15 }
  0x2e   : > { %s1054_s4 = scalar_lea.vmem %s1053_s15, 2048  ;;  %p1055_p2 = scmp.lt.s32.totalorder %s1446_s5, %s1053_s15 }
  0x2f   : > { %p1050_p8 = pnand %p1048_p6, %p1034_p7  ;;  %p1056_p10 = scmp.lt.s32.totalorder %s1054_s4, %s1047_s10 }
  0x31   : > { %p1051_p4 = pneg %p1050_p8  ;;  %p1057_p11 = por %p1056_p10, %p1055_p2 }
  0x33   : > { %p1058_p12 = pnand %p1057_p11, %p1051_p4 }
  0x35   : > { %1061 = shalt.err (!%p1058_p12)
}
  0x36   : > { %s1829_s13 = smov 512   ;;  %s1830_s14 = smov 128  }
  0x37   : > { %s1831_s17 = smov 8   ;;  %s1863_s10 = sshll.u32 %s1297_s8, 7 }
  0x38   : > { %878 = dma.hbm_to_vmem [thread:$0]  (!%p1450_p5), %s1444_s16, 1024, %s1446_s5, %s1454_s11, %s1829_s13, %s1830_s14, %s1831_s17  }
  0x39   : > { %s1490_s4 = scalar_lea.hbm %s1822_s2, %s1863_s10  ;;  %p770_p2 = scmp.ge.s32.totalorder %s1301_s9, 1 }
  0x3a   : > { %s1494_s1 = scalar_lea.hbm %s1490_s4, 256  ;;  %p307_p4 = scmp.lt.s32.totalorder %s1301_s9, 7 }
  0x3b   : > { %s1502_s30 = sadd.s32 4294967295, %s1301_s9   ;;  %s39_s16 = sadd.s32 1, %s1293_s7 }
  0x3c   : > { %p1497_p7 = pnand %p770_p2, %p307_p4  ;;  %p41_p5 = scmp.ge.s32.totalorder %s39_s16, 3 }
  0x3d   : > { %s43_s10 = sadd.s32 1, %s1297_s8  ;;  %s52_s12 = sadd.s32 1, %s1281_s29 }
  0x3e   : > { %s1864_s3 = scalar_select %p1497_p7, 1, 0 }
  0x3f   : > { %p59_p9 = scmp.ne.s32.totalorder %s1281_s29, %s1277_s28  ;;  %s1925_s16 = smov (%p41_p5, %s39_s16), 0 }
  0x40   : > { %1865 = sst [smem:[#allocation23_spill]] %s1925_s16  ;;  %s1927_s10 = smov (!%p41_p5, %s43_s10), %s1297_s8 }
  0x41   : > { %s47_s15 = ssub.s32 %s1293_s7, %s1925_s16  ;;  %p1517_p13 = por %p60_p0, %p59_p9 }
  0x42   : > { %p45_p1 = scmp.ge.s32.totalorder %s1927_s10, 2  ;;  %p50_p3 = scmp.eq.s32.totalorder %s47_s15, 0 }
  0x43   : > { %p65_p6 = scmp.ne.s32.totalorder %s1277_s28, %s1273_s27  ;;  %p66_p8 = scmp.eq.s32.totalorder %s1502_s30, 0 }
  0x44   : > { %s1929_s10 = smov (%p45_p1, %s1927_s10), 0  ;;  %s80_s27 = sadd.s32 1, %s1269_s26 }
  0x45   : > { %1867 = sst [smem:[#allocation24_spill]] %s1929_s10  ;;  %p1531_p10 = por %p66_p8, %p65_p6 }
  0x46   : > { %s1527_s14 = scalar_select %p50_p3, %s1281_s29, %s52_s12  }
  0x47   : > { %s1869_s17 = scalar_select %p1531_p10, 1, 0 }
  0x48   : > { %1868 = sst [smem:[#allocation25_spill]] %s1527_s14  ;;  %s76_s5 = ssub.s32 %s1297_s8, %s1929_s10 }
  0x49   : > { %1870 = sst [smem:[#allocation26_spill]] %s1869_s17  ;;  %p78_p11 = scmp.eq.s32.totalorder %s76_s5, 0 }
  0x4a   : > { %p1871_p12 = scmp.ne.s32.totalorder %s1265_s25, %s1261_s24  ;;  %s103_s12 = sadd.s32 2, %s1297_s8 }
  0x4b   : > { %s1549_s14 = scalar_select %p78_p11, %s1269_s26, %s80_s27  }
  0x4c   : > { %p1543_p2 = por %p1871_p12, %p66_p8  ;;  %s104_s6 = sadd.s32 2, %s1929_s10 }
  0x4d   : > { %1874 = sst [smem:[#allocation28_spill]] %s1549_s14  ;;  %s110_s17 = sadd.s32 1, %s1257_s23 }
  0x4e   : > { %s1872_s16 = scalar_select %p1543_p2, 1, 0 }
  0x4f   : > { %s106_s28 = ssub.s32 %s103_s12, %s104_s6  ;;  %p117_p4 = scmp.ne.s32.totalorder %s1257_s23, %s1253_s22 }
  0x50   : > { %1873 = sst [smem:[#allocation27_spill]] %s1872_s16  ;;  %p108_p5 = scmp.eq.s32.totalorder %s106_s28, 0 }
  0x51   : > { %p123_p9 = scmp.ne.s32.totalorder %s1253_s22, %s1249_s21  ;;  %p1559_p1 = por %p117_p4, %p60_p0 }
  0x52   : > { %s189_s8 = sor.u32 %s76_s5, %s47_s15  ;;  %s192_s6 = sadd.s32 1, %s1245_s20 }
  0x53   : > { %s1564_s16 = scalar_select %p108_p5, %s1257_s23, %s110_s17  }
  0x54   : > { %p1568_p3 = por %p123_p9, %p66_p8  ;;  %p190_p6 = scmp.eq.s32.totalorder %s189_s8, 0 }
  0x55   : > { %1876 = sst [smem:[#allocation29_spill]] %s1564_s16  ;;  %p202_p11 = scmp.ne.s32.totalorder %s1245_s20, %s1241_s19 }
  0x56   : > { %s1877_s27 = scalar_select %p1568_p3, 1, 0 }
  0x57   : > { %s1576_s21 = scalar_select %p190_p6, %s1245_s20, %s192_s6  }
  0x58   : > { %p203_p0 = scmp.eq.s32.totalorder %s1502_s30, 5  ;;  %p208_p12 = scmp.ne.s32.totalorder %s1241_s19, %s1237_s18 }
  0x59   : > { %s1878_s28 = sadd.s32 4294967294, %s1301_s9   ;;  %s229_s17 = sand.u32 1, %s1281_s29  }
  0x5a   : > { %p209_p4 = scmp.eq.s32.totalorder %s1878_s28, 5  ;;  %p1584_p5 = por %p203_p0, %p202_p11 }
  0x5b   : > { %s764_s15 = sshll.u32 %s229_s17, 3  ;;  %s765_s12 = sshll.u32 %s1293_s7, 7 }
  0x5c   : > { %s1879_s5 = scalar_select %p1584_p5, 1, 0 }
  0x5d   : > { %p1588_p8 = por %p209_p4, %p208_p12  ;;  %s1596_s6 = scalar_lea.hbm %s1820_s0, %s765_s12 }
  0x5e   : > { %s233_s28 = scalar_lea.vmem [#allocation4], %s764_s15  ;;  %p1881_p9 = scmp.lt.s32.totalorder %s1301_s9, 6 }
  0x5f   : > { %s1880_s8 = scalar_select %p1588_p8, 1, 0 }
  0x60   : > { %s241_s29 = sshll.u32 %s233_s28, 4  ;;  %p1604_p6 = pnand %p1881_p9, %p1517_p13  ;;  %s1598_s29 = int_to_ptr.vmem [resolvable:$true] %s241_s29 }
  0x61   : > { %s273_s7 = sand.u32 1, %s1257_s23   ;;  %p1883_p11 = pmov %p1881_p9 }
  0x62   : > { %s1617_s10 = sshll.u32 %s273_s7, 6  ;;  %s230_s15 = scalar_lea.sflag [#allocation5], %s229_s17 }
  0x63   : > { %p1613_p0 = pnand %p1883_p11, %p1559_p1  ;;  %s1062_s12 = scalar_lea.hbm %s1596_s6, 128 }
  0x64   : > { %p1063_p12 = scmp.ne.s32.totalorder %s1596_s6, %s1062_s12  ;;  %p1064_p4 = pneg %p1604_p6 }
  0x65   : > { %s1067_s24 = scalar_lea.hbm %s1820_s0, 384  ;;  %p1068_p1 = scmp.lt.u32.totalorder %s1596_s6, %s1820_s0 }
  0x66   : > { %p1065_p13 = pnand %p1064_p4, %p1063_p12  ;;  %p1069_p11 = scmp.lt.u32.totalorder %s1067_s24, %s1062_s12 }
  0x67   : > { %p1071_p5 = scmp.lt.u32.totalorder %s1062_s12, %s1596_s6 }
  0x68   : > { %p1066_p9 = pneg %p1065_p13  ;;  %p1070_p8 = por %p1069_p11, %p1068_p1 }
  0x6a   : > { %p1072_p3 = por %p1071_p5, %p1070_p8 }
  0x6c   : > { %p1073_p2 = pnand %p1072_p3, %p1066_p9 }
  0x6e   : > { %1076 = shalt.err (!%p1073_p2)
}
  0x6f   : > { %s1077_s7 = scalar_lea.vmem %s1598_s29, 128  ;;  %s1307_s17 = smov [#allocation4]  }
  0x70   : > { %p1078_p12 = scmp.ne.s32.totalorder %s1598_s29, %s1077_s7  ;;  %s1082_s13 = sshll.u32 %s1307_s17, 4  ;;  %s1083_s13 = int_to_ptr.vmem [resolvable:$false] %s1082_s13 }
  0x71   : > { %s1084_s23 = scalar_lea.vmem %s1083_s13, 256  ;;  %p1085_p7 = scmp.lt.s32.totalorder %s1598_s29, %s1083_s13 }
  0x72   : > { %p1080_p13 = pnand %p1078_p12, %p1064_p4  ;;  %p1086_p1 = scmp.lt.s32.totalorder %s1084_s23, %s1077_s7 }
  0x74   : > { %p1081_p10 = pneg %p1080_p13  ;;  %p1087_p11 = por %p1086_p1, %p1085_p7 }
  0x76   : > { %p1088_p5 = pnand %p1087_p11, %p1081_p10 }
  0x78   : > { %1091 = shalt.err (!%p1088_p5)
}
  0x79   : > { %875 = dma.hbm_to_vmem [thread:$0]  (!%p1604_p6), %s1596_s6, 128, %s1598_s29, %s230_s15  }
  0x7a   : > { %s275_s16 = scalar_lea.vmem [#allocation9], %s1617_s10  ;;  %s1122_s28 = scalar_lea.hbm %s1490_s4, 1280 }
  0x7b   : > { %s285_s12 = sshll.u32 %s275_s16, 4  ;;  %p1093_p7 = scmp.ne.s32.totalorder %s1494_s1, %s1122_s28  ;;  %s1645_s12 = int_to_ptr.vmem [resolvable:$true] %s285_s12 }
  0x7c   : > { %p1094_p10 = pneg %p1613_p0  ;;  %s1097_s7 = scalar_lea.hbm %s1822_s2, 4096 }
  0x7d   : > { %p1098_p8 = scmp.lt.u32.totalorder %s1494_s1, %s1822_s2  ;;  %p1099_p6 = scmp.lt.u32.totalorder %s1097_s7, %s1122_s28 }
  0x7e   : > { %p1095_p2 = pnand %p1094_p10, %p1093_p7  ;;  %p1101_p9 = scmp.lt.u32.totalorder %s1122_s28, %s1494_s1 }
  0x7f   : > { %p1100_p4 = por %p1099_p6, %p1098_p8 }
  0x80   : > { %p1096_p3 = pneg %p1095_p2 }
  0x81   : > { %p1102_p12 = por %p1101_p9, %p1100_p4 }
  0x83   : > { %p1103_p13 = pnand %p1102_p12, %p1096_p3 }
  0x85   : > { %1106 = shalt.err (!%p1103_p13)
}
  0x86   : > { %s1107_s29 = scalar_lea.vmem %s1645_s12, 1024  ;;  %s1308_s4 = smov [#allocation9]  }
  0x87   : > { %p1108_p1 = scmp.ne.s32.totalorder %s1645_s12, %s1107_s29  ;;  %s1112_s6 = sshll.u32 %s1308_s4, 4  ;;  %s1113_s6 = int_to_ptr.vmem [resolvable:$false] %s1112_s6 }
  0x88   : > { %s1114_s10 = scalar_lea.vmem %s1113_s6, 2048  ;;  %p1115_p7 = scmp.lt.s32.totalorder %s1645_s12, %s1113_s6 }
  0x89   : > { %p1110_p11 = pnand %p1108_p1, %p1094_p10  ;;  %p1116_p2 = scmp.lt.s32.totalorder %s1114_s10, %s1107_s29 }
  0x8b   : > { %p1111_p5 = pneg %p1110_p11  ;;  %p1117_p8 = por %p1116_p2, %p1115_p7 }
  0x8d   : > { %p1118_p6 = pnand %p1117_p8, %p1111_p5 }
  0x8f   : > { %1121 = shalt.err (!%p1118_p6)
}
  0x90   : > { %s1885_s15 = smov 8   ;;  %s1886_s23 = smov 128  }
  0x91   : > { %s1887_s16 = smov 512   ;;  %p1888_p10 = scmp.ne.s32.totalorder %s1864_s3, 0 }
  0x92   : > { %881 = dma.hbm_to_vmem [thread:$0]  (!%p1613_p0), %s1494_s1, 1024, %s1645_s12, %s1454_s11, %s1887_s16, %s1886_s23, %s1885_s15  }
  0x93   : > { %311 = sbr.rel (%p1888_p10) target bundleno = 436 (0x1b4), region = 40  ;;  %s1889_s28 = sld [smem:[#allocation17_spill]] (!%p1888_p10) }
  0x94   : > { %s1890_s26 = sld [smem:[#allocation26_spill]] (!%p1888_p10) }
  0x99   : > { %s313_s24 = sand.u32 (!%p1888_p10), 1, %s1889_s28  }
  0x9a   : > { %s1679_s7 = sshll.u32 %s313_s24, 3  ;;  %s314_s17 = scalar_lea.sflag [#allocation5], %s313_s24 }
  0x9b   : > { %s317_s13 = scalar_lea.vmem [#allocation4], %s1679_s7  ;;  %p1891_p3 = scmp.ne.s32.totalorder %s1890_s26, 0 }
  0x9d   : > { %1220 = dma.done.wait (%p1891_p3), %s314_s17, 128  }
  0x9e   : > { %1222 = vsyncadd (%p1891_p3), %s314_s17, 4294967168  ;;  %s1892_s14 = sld [smem:[#allocation27_spill]]  ;;  %s322_s1 = sand.u32 1, %s1502_s30  }
  0x9f   : > { %s324_s11 = sand.u32 1, %s1265_s25   ;;  %s323_s12 = scalar_lea.sflag [#allocation8], %s322_s1 }
  0xa0   : > { %s772_s3 = sshll.u32 %s324_s11, 6 }
  0xa1   : > { %s1688_s29 = scalar_lea.vmem [#allocation7], %s772_s3 }
  0xa4   : > { %p1893_p0 = scmp.ne.s32.totalorder %s1892_s14, 0 }
  0xa6   : > { %1224 = dma.done.wait (%p1893_p0), %s323_s12, 1024  }
  0xa7   : > { %1226 = vsyncadd (%p1893_p0), %s323_s12, 4294966272  ;;  %s333_s4 = sand.u32 1, %s1253_s22   ;;  %p1894_p4 = scmp.ne.s32.totalorder %s1877_s27, 0 }
  0xa8   : > { %s773_s6 = sshll.u32 %s333_s4, 6 }
  0xa9   : > { %s1695_s10 = scalar_lea.vmem [#allocation9], %s773_s6 }
  0xaa   : > { %1228 = dma.done.wait (%p1894_p4), %s323_s12, 1024  }
  0xab   : > { %1230 = vsyncadd (%p1894_p4), %s323_s12, 4294966272  ;;  %v1309_v0 = vmov 0.0|0.0   ;;  %vm1310_vm0 = vmmov 0   ;;  %v1311_v1 = vmov 0.0   ;;  %v405_v2 = vld [vmem:[%s1695_s10] sm:$0xff]  ;;  %v406_v3 = vld [vmem:[%s1695_s10 + $0x8] sm:$0xff] }
  0xac   : > { %852 = vmatprep.subr.bf16.mxu1 %v1309_v0  ;;  %837 = vmatprep.mubr.msk.f32.mxu1 %vm1310_vm0, %v1311_v1  ;;  %v407_v4 = vld [vmem:[%s1695_s10 + $0x10] sm:$0xff]  ;;  %v853_v5 = vpack.c.bf16 %v406_v3, %v405_v2  ;;  %v408_v6 = vld [vmem:[%s1695_s10 + $0x18] sm:$0xff]  ;;  %v397_v8 = vld [vmem:[%s1688_s29] sm:$0xff]  ;;  %s1895_s30 = sld [smem:[#allocation20_spill]]  ;;  %vm414_vm1 = vcmask 523264   ;;  %s1896_s15 = sld [smem:[#allocation19_spill]] }
  0xad   : > { %840 = vmatprep.subr.bf16.mxu0 %v1309_v0  ;;  %818 = vmatprep.mubr.msk.f32.mxu0 %vm1310_vm0, %v1311_v1  ;;  %v856_v7 = vpack.c.bf16 %v408_v6, %v407_v4  ;;  %v398_v9 = vld [vmem:[%s1688_s29 + $0x8] sm:$0xff]  ;;  %v399_v10 = vld [vmem:[%s1688_s29 + $0x10] sm:$0xff]  ;;  %v409_v11 = vld [vmem:[%s1695_s10 + $0x20] sm:$0xff]  ;;  %s1897_s28 = sld [smem:[#allocation32_spill]]  ;;  %s376_s7 = sand.u32 1, %s1241_s19  }
  0xae   : > { %854 = vmatpush3.bf16.msra.mxu1 %v853_v5  ;;  %v410_v12 = vld [vmem:[%s1695_s10 + $0x28] sm:$0xff]  ;;  %v841_v13 = vpack.c.bf16 %v398_v9, %v397_v8  ;;  %v400_v14 = vld [vmem:[%s1688_s29 + $0x18] sm:$0xff]  ;;  %v401_v17 = vld [vmem:[%s1688_s29 + $0x20] sm:$0xff]  ;;  %s1898_s14 = sld [smem:[#allocation31_spill]]  ;;  %s774_s11 = sshll.u32 %s376_s7, 3 }
  0xaf   : > { %855 = vmatprep.subr.bf16.mxu1 %v1309_v0  ;;  %v844_v15 = vpack.c.bf16 %v400_v14, %v399_v10  ;;  %v859_v16 = vpack.c.bf16 %v410_v12, %v409_v11  ;;  %v402_v18 = vld [vmem:[%s1688_s29 + $0x28] sm:$0xff]  ;;  %v411_v19 = vld [vmem:[%s1695_s10 + $0x30] sm:$0xff]  ;;  %v412_v20 = vld [vmem:[%s1695_s10 + $0x38] sm:$0xff]  ;;  %s378_s4 = scalar_lea.vmem [#allocation10], %s774_s11  ;;  %s1899_s23 = sld [smem:[#allocation33_spill]] }
  0xb0   : > { %842 = vmatpush3.bf16.msra.mxu0 %v841_v13  ;;  %v847_v21 = vpack.c.bf16 %v402_v18, %v401_v17  ;;  %v862_v22 = vpack.c.bf16 %v412_v20, %v411_v19  ;;  %v403_v23 = vld [vmem:[%s1688_s29 + $0x30] sm:$0xff]  ;;  %v404_v24 = vld [vmem:[%s1688_s29 + $0x38] sm:$0xff]  ;;  %s607_s6 = sshll.u32 %s378_s4, 4  ;;  %p1901_p1 = scmp.ne.s32.totalorder %s1879_s5, 0  ;;  %s1736_s6 = int_to_ptr.vmem [resolvable:$true] %s607_s6 }
  0xb1   : > { %843 = vmatprep.subr.bf16.mxu0 %v1309_v0  ;;  %v850_v25 = vpack.c.bf16 %v404_v24, %v403_v23  ;;  %v396_v26 = vld [vmem:[%s317_s13] sm:$0xff] }
  0xb2   : > { %857 = vmatpush3.bf16.msra.mxu1 %v856_v7  ;;  %s385_s27 = sadd.s32 2, %s1895_s30  ;;  %p382_p12 = scmp.lt.s32.totalorder %s1895_s30, 3 }
  0xb3   : > { %858 = vmatprep.subr.bf16.mxu1 %v1309_v0  ;;  %p386_p9 = scmp.lt.s32.totalorder %s385_s27, 3  ;;  %s780_s3 = sshll.u32 %s1896_s15, 1 }
  0xb4   : > { %845 = vmatpush3.bf16.msra.mxu0 %v844_v15  ;;  %s383_s24 = scalar_select %p382_p12, %s1895_s30, 3 }
  0xb5   : > { %846 = vmatprep.subr.bf16.mxu0 %v1309_v0  ;;  %s1931_s27 = smov (!%p386_p9, %s385_s27), 3  ;;  %s603_s12 = sadd.s32 %s1895_s30, %s780_s3 }
  0xb6   : > { %860 = vmatpush3.bf16.msra.mxu1 %v859_v16  ;;  %s388_s26 = scalar_lea.vmem %s1897_s28, %s1931_s27  ;;  %s384_s1 = scalar_lea.vmem %s1898_s14, %s383_s24 }
  0xb7   : > { %861 = vmatprep.subr.bf16.mxu1 %v1309_v0  ;;  %v778_v27 = vld [vmem:[%s388_s26] ss:$0 sm:$0xff]  ;;  %s781_s29 = sshll.u32 %s603_s12, 7  ;;  %s1900_s16 = smov %s1899_s23 }
  0xb8   : > { %848 = vmatpush3.bf16.msra.mxu0 %v847_v21  ;;  %v777_v34 = vld [vmem:[%s384_s1] ss:$0 sm:$0xff]  ;;  %s1734_s28 = scalar_lea.hbm %s1899_s23, %s781_s29  ;;  %s592_s30 = scalar_lea.sflag [#allocation6], %s376_s7 }
  0xb9   : > { %849 = vmatprep.subr.bf16.mxu0 %v1309_v0  ;;  %s1123_s15 = scalar_lea.vmem %s1736_s6, 128  ;;  %s1312_s26 = smov [#allocation10]  }
  0xba   : > { %863 = vmatpush3.bf16.msra.mxu1 %v862_v22  ;;  %p1124_p13 = scmp.ne.s32.totalorder %s1736_s6, %s1123_s15  ;;  %s1127_s24 = sshll.u32 %s1312_s26, 4  ;;  %s1128_s24 = int_to_ptr.vmem [resolvable:$false] %s1127_s24 }
  0xbb   : > { %s1129_s17 = scalar_lea.vmem %s1128_s24, 256  ;;  %p1130_p7 = scmp.lt.s32.totalorder %s1736_s6, %s1128_s24 }
  0xbc   : > { %851 = vmatpush3.bf16.msra.mxu0 %v850_v25  ;;  %p1125_p11 = pnand %p1124_p13, %p1901_p1  ;;  %p1131_p2 = scmp.lt.s32.totalorder %s1129_s17, %s1123_s15 }
  0xbd   : > { %838 = vmatmul.mubr.msk.f32.vlgmr.msra.gmra.mrb[0].mxu1 %vm414_vm1, %v396_v26 }
  0xbe   : > { %p1126_p5 = pneg %p1125_p11  ;;  %p1132_p8 = por %p1131_p2, %p1130_p7 }
  0xbf   : > { %819 = vmatmul.mubr.msk.f32.vlgmr.msra.gmra.mrb[0].mxu0 %vm414_vm1, %v396_v26 }
  0xc0   : > { %p1133_p6 = pnand %p1132_p8, %p1126_p5 }
 0x190   : > { %v557_v28 = vpop.f32.mrb[0].mxu1 }
 0x191   : > { %v583_v29 = vadd.f32 %v778_v27, %v557_v28  ;;  %v839_v30 = vpop.f32.mrb[1].mxu1 }
 0x192   : > { %v484_v32 = vpop.f32.mrb[0].mxu0 }
 0x193   : > { %v585_v31 = vmul.f32 0.70710677, %v583_v29  ;;  %v820_v33 = vpop.f32.mrb[1].mxu0  ;;  %v584_v36 = vmul.f32 0.5, %v583_v29  ;;  %v574_v38 = vadd.f32 %v777_v34, %v484_v32 }
 0x195   : > { %1030 = verf.f32 %v585_v31 }
 0x19f   : > { %v1031_v35 = vpop.eup %1030 }
 0x1a0   : > { %v587_v37 = vadd.f32 1.0, %v1031_v35 }
 0x1a2   : > { %v588_v39 = vmul.f32 %v587_v37, %v584_v36 }
 0x1a4   : > { %v589_v40 = vmul.f32 %v588_v39, %v574_v38 }
 0x1a6   : > { %590 = vst [vmem:[%s378_s4] sm:$0xff] %v589_v40 }
 0x1a7   : > { %1136 = shalt.err (!%p1133_p6)
}
 0x1a8   : > { %s1137_s7 = scalar_lea.hbm %s1734_s28, 128  ;;  %s1141_s1 = scalar_lea.hbm %s1900_s16, 768 }
 0x1a9   : > { %p1138_p10 = scmp.ne.s32.totalorder %s1734_s28, %s1137_s7  ;;  %p1142_p4 = scmp.lt.u32.totalorder %s1734_s28, %s1900_s16 }
 0x1aa   : > { %p1143_p9 = scmp.lt.u32.totalorder %s1141_s1, %s1137_s7  ;;  %p1145_p13 = scmp.lt.u32.totalorder %s1137_s7, %s1734_s28 }
 0x1ab   : > { %p1139_p3 = pnand %p1138_p10, %p1901_p1 }
 0x1ac   : > { %p1144_p12 = por %p1143_p9, %p1142_p4 }
 0x1ad   : > { %p1140_p0 = pneg %p1139_p3 }
 0x1ae   : > { %p1146_p11 = por %p1145_p13, %p1144_p12 }
 0x1b0   : > { %p1147_p5 = pnand %p1146_p11, %p1140_p0 }
 0x1b2   : > { %1150 = shalt.err (!%p1147_p5)
}
 0x1b3   : > { %870 = dma.vmem_to_hbm [thread:$0]  (%p1901_p1), %s1736_s6, 128, %s1734_s28, %s592_s30  }
 0x1b4 PF: > { %p887_p7 = scmp.ge.s32.totalorder %s1301_s9, 2  ;;  %s619_s12 = sand.u32 1, %s1237_s18  }
 0x1b5   : > { %p1902_p2 = scmp.ne.s32.totalorder %s1880_s8, 0  ;;  %s620_s29 = scalar_lea.sflag [#allocation6], %s619_s12 }
 0x1b7   : > { %p883_p8 = pnand %p887_p7, %p1902_p2 }
 0x1b9   : > { %1232 = dma.done.wait (!%p883_p8), %s620_s29, 128  }
 0x1ba   : > { %1234 = vsyncadd (!%p883_p8), %s620_s29, 4294967168  ;;  %s24_s9 = sadd.s32 1, %s1301_s9   ;;  %s1904_s5 = sld [smem:[#allocation15_spill]] }
 0x1bb   : > { %p1764_p6 = scmp.ge.s32.totalorder %s24_s9, 8   ;;  %s1905_s23 = sld [smem:[#allocation29_spill]] }
 0x1bc   : > { %s1906_s6 = sld [smem:[#allocation16_spill]]  ;;  %s1908_s27 = sld [smem:[#allocation17_spill]] }
 0x1bd   : > { %s1907_s26 = sld [smem:[#allocation28_spill]]  ;;  %s1909_s28 = sld [smem:[#allocation18_spill]] }
 0x1be   : > { %s1910_s29 = sld [smem:[#allocation25_spill]]  ;;  %s1911_s30 = sld [smem:[#allocation21_spill]] }
 0x1bf   : > { %s1912_s8 = sld [smem:[#allocation22_spill]]  ;;  %s1913_s7 = sld [smem:[#allocation23_spill]] }
 0x1c0   : > { %s1914_s10 = sld [smem:[#allocation24_spill]]  ;;  %s1915_s18 = smov %s1241_s19 }
 0x1c1   : > { %s1916_s19 = smov %s1245_s20  ;;  %s1917_s20 = smov %s1576_s21 }
 0x1c2   : > { %s1918_s21 = smov %s1253_s22  ;;  %s1919_s22 = smov %s1904_s5 }
 0x1c3   : > { %s1920_s24 = smov %s1265_s25  ;;  %s1921_s25 = smov %s1906_s6 }
 0x1c4   :  { %23 = sbr.rel (!%p1764_p6) target bundleno = 19 (0x13), region = 123 }
 0x1c5   : > { %s1922_s6 = smov %s1912_s8 }
 0x1c6   : > { %s1923_s8 = smov %s1914_s10 }
 0x1cb   :  { %625 = vsyncpa [#allocation5], 1 }
 0x1cc   :  { %627 = vsyncpa [#allocation5 + $0x1], 1 }
 0x1cd   :  { %628 = vsyncpa [#allocation8], 1 }
 0x1ce   :  { %630 = vsyncpa [#allocation8 + $0x1], 1 }
 0x1cf   :  { %631 = vsyncpa [#allocation6], 1 }
 0x1d0   :  { %633 = vsyncpa [#allocation6 + $0x1], 1 }

</bundles_post_ra>
